<compile_context>
chip_gen: v7x
topology: tpu7x:2x2x1
jax: 0.10.0
libtpu: 0.0.40
codegen_flags: <defaults>
</compile_context>

<pallas_src>
import math

import jax
import jax.numpy as jnp
from jax.experimental import pallas as pl
from jax.experimental.pallas import tpu as pltpu


def _ceil_to(x: int, m: int) -> int:
    return ((x + m - 1) // m) * m


def _pick_tile(extent: int, unit: int, max_tile: int) -> int:
    """Largest multiple of `unit` <= max_tile that divides `extent`
    (extent is already a multiple of `unit`); falls back to the capped max."""
    cap = max(unit, (min(max_tile, extent) // unit) * unit)
    t = cap
    while t >= unit:
        if extent % t == 0:
            return t
        t -= unit
    return cap


# ----------------------------------------------------------------------------
# Kernel: one (tm, tn) output tile, K is the last (reduction) grid axis.
# ----------------------------------------------------------------------------
def noisy_linear_kernel(x_ref, ein_ref, wmu_ref, wsig_ref, beff_ref,
                        o_ref, acc_ref):
    k = pl.program_id(2)

    @pl.when(k == 0)
    def _():
        acc_ref[...] = jnp.zeros_like(acc_ref)

    x = x_ref[...]                            # (tm, tk) bf16
    xe = x * ein_ref[...]                     # scale cols by eps_in (bf16, VPU)

    # Standard (tm,tk) @ (tk,tn) contractions — weights already in (K, N)
    # layout from the one-time prep, so no in-kernel transpose is needed.
    acc_ref[...] += (
        jnp.dot(x, wmu_ref[...], preferred_element_type=jnp.float32)
        + jnp.dot(xe, wsig_ref[...], preferred_element_type=jnp.float32))

    @pl.when(k == pl.num_programs(2) - 1)
    def _():
        o_ref[...] = (acc_ref[...] + beff_ref[...]).astype(o_ref.dtype)


# ----------------------------------------------------------------------------
# One-time weight / noise prep (call once per reset_noise / param update).
# ----------------------------------------------------------------------------
def prepare_noisy_linear_weights(weight_mu, weight_sigma, eps_in, eps_out,
                                 bias_mu, bias_sigma, bias_epsilon,
                                 *, tn_max=256, tk_max=1024):
    N, K = weight_mu.shape
    K128 = _ceil_to(K, 128)
    N128 = _ceil_to(N, 128)

    tk = _pick_tile(K128, 128, tk_max)
    tn = _pick_tile(N128, 128, tn_max)
    Kp = _ceil_to(K128, tk)
    Np = _ceil_to(N128, tn)
    # v7x megacore hint: keep >= 2 tiles along a "parallel" axis when possible.
    if Np // tn == 1 and tn % 256 == 0:
        tn //= 2

    f32, bf16 = jnp.float32, jnp.bfloat16

    # Fold eps_out into weight_sigma; transpose both weights to (K, N);
    # pad to tile-aligned extents; cast to bf16 — all exactly once.
    wsig_eff = weight_sigma.astype(f32) * eps_out.astype(f32)[:, None]   # (N, K)
    wmu_kn = jnp.pad(weight_mu.astype(f32).T,
                     ((0, Kp - K), (0, Np - N))).astype(bf16)            # (Kp, Np)
    wsig_kn = jnp.pad(wsig_eff.T,
                      ((0, Kp - K), (0, Np - N))).astype(bf16)           # (Kp, Np)
    ein_row = jnp.pad(eps_in.astype(bf16).reshape(1, K), ((0, 0), (0, Kp - K)))
    b_eff = (bias_mu.astype(f32)
             + bias_sigma.astype(f32) * bias_epsilon.astype(f32))
    beff_row = jnp.pad(b_eff.reshape(1, N), ((0, 0), (0, Np - N)))       # (1, Np) f32

    return dict(wmu_kn=wmu_kn, wsig_kn=wsig_kn, ein_row=ein_row,
                beff_row=beff_row, N=N, K=K, Np=Np, Kp=Kp, tn=tn, tk=tk)


# ----------------------------------------------------------------------------
# Per-call forward: only x is padded / cast here (cheap, activation-sized).
# ----------------------------------------------------------------------------
def noisy_linear_forward(x, prep, *, tm_max=256, out_dtype=None):
    M, K = x.shape
    assert K == prep["K"], (K, prep["K"])
    Kp, Np, tn, tk = prep["Kp"], prep["Np"], prep["tn"], prep["tk"]
    N = prep["N"]
    out_dtype = out_dtype or x.dtype

    M8 = _ceil_to(M, 8)
    tm = _pick_tile(M8, 8, tm_max)
    Mp = _ceil_to(M8, tm)

    x_p = jnp.pad(x.astype(jnp.bfloat16), ((0, Mp - M), (0, Kp - K)))

    grid = (Mp // tm, Np // tn, Kp // tk)

    out_bytes = jnp.dtype(out_dtype).itemsize
    flops = 4 * Mp * Np * Kp                                # two bf16 matmuls
    bytes_accessed = int(grid[1] * Mp * Kp * 2              # x, refetched per N tile
                         + grid[0] * 2 * Kp * Np * 2        # both weights per M tile
                         + Mp * Np * out_bytes
                         + Kp * 2 + Np * 4)
    # Explicit scoped-VMEM budget (double-buffered inputs + out + accumulator),
    # clamped so it stays valid across v5e (16 MiB default) and v7x (64 MiB phys).
    vmem_need = (2 * (tm * tk * 2 + 2 * tk * tn * 2 + tk * 2 + tn * 4)
                 + 2 * tm * tn * out_bytes + tm * tn * 4)
    vmem_limit = int(min(48 * 2**20, max(32 * 2**20, 2 * vmem_need)))

    out = pl.pallas_call(
        noisy_linear_kernel,
        out_shape=jax.ShapeDtypeStruct((Mp, Np), out_dtype),
        grid_spec=pltpu.PrefetchScalarGridSpec(
            num_scalar_prefetch=0,
            grid=grid,
            in_specs=[
                pl.BlockSpec((tm, tk), lambda i, j, k: (i, k)),   # x (bf16)
                pl.BlockSpec((1, tk), lambda i, j, k: (0, k)),    # eps_in row (bf16)
                pl.BlockSpec((tk, tn), lambda i, j, k: (k, j)),   # W_mu^T (bf16)
                pl.BlockSpec((tk, tn), lambda i, j, k: (k, j)),   # (W_sig*eps_out)^T
                pl.BlockSpec((1, tn), lambda i, j, k: (0, j)),    # fused bias row (f32)
            ],
            out_specs=pl.BlockSpec((tm, tn), lambda i, j, k: (i, j)),
            scratch_shapes=[pltpu.VMEM((tm, tn), jnp.float32)],
        ),
        compiler_params=pltpu.CompilerParams(
            dimension_semantics=("parallel", "parallel", "arbitrary"),
            vmem_limit_bytes=vmem_limit),
        cost_estimate=pl.CostEstimate(flops=flops, transcendentals=0,
                                      bytes_accessed=bytes_accessed),
    )(x_p, prep["ein_row"], prep["wmu_kn"], prep["wsig_kn"], prep["beff_row"])

    return out[:M, :N]


# ----------------------------------------------------------------------------
# Parameter / noise initialization (plain JAX re-implementation of
# reset_parameters() + reset_noise(); done outside the kernel).
# ----------------------------------------------------------------------------
def scale_noise(key, size):
    """Factorized gaussian noise: sign(x) * sqrt(|x|)."""
    x = jax.random.normal(key, (size,), dtype=jnp.float32)
    return jnp.sign(x) * jnp.sqrt(jnp.abs(x))


def init_noisy_linear(key, in_features, out_features, std_init=0.5):
    k_wmu, k_bmu, k_ein, k_eout = jax.random.split(key, 4)
    mu_range = 1.0 / math.sqrt(in_features)

    weight_mu = jax.random.uniform(
        k_wmu, (out_features, in_features), jnp.float32, -mu_range, mu_range)
    weight_sigma = jnp.full((out_features, in_features),
                            std_init / math.sqrt(in_features), jnp.float32)
    bias_mu = jax.random.uniform(
        k_bmu, (out_features,), jnp.float32, -mu_range, mu_range)
    bias_sigma = jnp.full((out_features,),
                          std_init / math.sqrt(out_features), jnp.float32)

    eps_in = scale_noise(k_ein, in_features)
    eps_out = scale_noise(k_eout, out_features)
    # torch buffers: weight_epsilon = outer(eps_out, eps_in); bias_epsilon = eps_out.
    return dict(weight_mu=weight_mu, weight_sigma=weight_sigma,
                bias_mu=bias_mu, bias_sigma=bias_sigma,
                eps_in=eps_in, eps_out=eps_out, bias_epsilon=eps_out)


if __name__ == "__main__":
    key = jax.random.PRNGKey(0)

    def run_case(case_key, batch, in_features, out_features):
        kp, kx = jax.random.split(case_key)
        params = init_noisy_linear(kp, in_features, out_features)
        x = jax.random.normal(kx, (batch, in_features), dtype=jnp.float32)

        # One-time weight prep (cached across forward calls).
        prep = prepare_noisy_linear_weights(
            params["weight_mu"], params["weight_sigma"],
            params["eps_in"], params["eps_out"],
            params["bias_mu"], params["bias_sigma"], params["bias_epsilon"])
        prep = jax.tree_util.tree_map(
            lambda v: jax.block_until_ready(v) if isinstance(v, jax.Array) else v,
            prep)

        y = noisy_linear_forward(x, prep)
        y = jax.block_until_ready(y)

        # Plain-JAX reference of the exact torch forward semantics
        # (materializes weight_epsilon only for the check).
        w_eps = jnp.outer(params["eps_out"], params["eps_in"])
        w_eff = params["weight_mu"] + params["weight_sigma"] * w_eps
        b_eff = params["bias_mu"] + params["bias_sigma"] * params["bias_epsilon"]
        y_ref = x @ w_eff.T + b_eff

        assert y.shape == (batch, out_features)
        # bf16 MXU operands with f32 accumulation -> loosened tolerance.
        assert jnp.allclose(y, y_ref, atol=5e-2, rtol=5e-2), (
            "max abs err", float(jnp.max(jnp.abs(y - y_ref))))

        # Second call with the same cached prep (different batch) — exercises
        # the cheap per-call path (no weight re-pad/cast).
        x2 = jax.random.normal(jax.random.fold_in(kx, 1),
                               (max(1, batch // 2), in_features), jnp.float32)
        y2 = jax.block_until_ready(noisy_linear_forward(x2, prep))
        y2_ref = x2 @ w_eff.T + b_eff
        assert jnp.allclose(y2, y2_ref, atol=5e-2, rtol=5e-2)

    k1, k2 = jax.random.split(key)
    # Small, unaligned shapes (exercises the padding path).
    run_case(k1, batch=8, in_features=32, out_features=16)
    # Larger shapes exercising multi-tile N and the K reduction axis.
    run_case(k2, batch=64, in_features=1024, out_features=512)

    print("KERNEL_OK")
</pallas_src>

<mosaic_0001>
module attributes {stable_mosaic.version = 11 : i64} {
  func.func @noisy_linear_kernel(%arg0: i32, %arg1: i32, %arg2: i32, %arg3: memref<8x128xbf16, #tpu.memory_space<vmem>>, %arg4: memref<1x128xbf16, #tpu.memory_space<vmem>>, %arg5: memref<128x128xbf16, #tpu.memory_space<vmem>>, %arg6: memref<128x128xbf16, #tpu.memory_space<vmem>>, %arg7: memref<1x128xf32, #tpu.memory_space<vmem>>, %arg8: memref<8x128xf32, #tpu.memory_space<vmem>>, %arg9: memref<8x128xf32, #tpu.memory_space<vmem>>) attributes {dimension_semantics = [#tpu.dimension_semantics<parallel>, #tpu.dimension_semantics<parallel>, #tpu.dimension_semantics<arbitrary>], iteration_bounds = array<i64: 1, 1, 1>, scalar_prefetch = 0 : i64, scratch_operands = 1 : i64, tpu.core_type = #tpu.core_type<tc>, window_params = [{transform_indices = @transform_0, window_bounds = array<i64: 8, 128>}, {transform_indices = @transform_1, window_bounds = array<i64: 1, 128>}, {transform_indices = @transform_2, window_bounds = array<i64: 128, 128>}, {transform_indices = @transform_3, window_bounds = array<i64: 128, 128>}, {transform_indices = @transform_4, window_bounds = array<i64: 1, 128>}, {transform_indices = @transform_5, window_bounds = array<i64: 8, 128>}]} {
    %c0_i32 = arith.constant 0 : i32
    %0 = arith.cmpi eq, %arg2, %c0_i32 : i32
    %1 = arith.extui %0 : i1 to i32
    %c0_i32_0 = arith.constant 0 : i32
    %2 = arith.cmpi ne, %1, %c0_i32_0 : i32
    scf.if %2 {
      %cst_15 = arith.constant 0.000000e+00 : f32
      %18 = vector.broadcast %cst_15 : f32 to vector<8x128xf32>
      %c0_16 = arith.constant 0 : index
      %c0_17 = arith.constant 0 : index
      %19 = vector.load %arg9[%c0_16, %c0_17] : memref<8x128xf32, #tpu.memory_space<vmem>>, vector<8x128xf32>
      tpu.vector_store %arg9[%c0_16, %c0_17], %18 {strides = array<i32>} : memref<8x128xf32, #tpu.memory_space<vmem>>, vector<8x128xf32>,
    } else {
    }
    %c0 = arith.constant 0 : index
    %c0_1 = arith.constant 0 : index
    %3 = vector.load %arg3[%c0, %c0_1] : memref<8x128xbf16, #tpu.memory_space<vmem>>, vector<8x128xbf16>
    %c0_2 = arith.constant 0 : index
    %c0_3 = arith.constant 0 : index
    %4 = vector.load %arg4[%c0_2, %c0_3] : memref<1x128xbf16, #tpu.memory_space<vmem>>, vector<1x128xbf16>
    %5 = vector.broadcast %4 : vector<1x128xbf16> to vector<8x128xbf16>
    %6 = arith.mulf %3, %5 : vector<8x128xbf16>
    %c0_4 = arith.constant 0 : index
    %c0_5 = arith.constant 0 : index
    %7 = vector.load %arg9[%c0_4, %c0_5] : memref<8x128xf32, #tpu.memory_space<vmem>>, vector<8x128xf32>
    %c0_6 = arith.constant 0 : index
    %c0_7 = arith.constant 0 : index
    %8 = vector.load %arg5[%c0_6, %c0_7] : memref<128x128xbf16, #tpu.memory_space<vmem>>, vector<128x128xbf16>
    %cst = arith.constant dense<0.000000e+00> : vector<8x128xf32>
    %9 = tpu.matmul %3, %8, %cst {dimension_numbers = #tpu.dot_dimension_numbers<[1], [0], [0], [1], [0, 0, 1, 1], [], []>} : vector<8x128xbf16>, vector<128x128xbf16>, vector<8x128xf32> -> vector<8x128xf32>
    %c0_8 = arith.constant 0 : index
    %c0_9 = arith.constant 0 : index
    %10 = vector.load %arg6[%c0_8, %c0_9] : memref<128x128xbf16, #tpu.memory_space<vmem>>, vector<128x128xbf16>
    %cst_10 = arith.constant dense<0.000000e+00> : vector<8x128xf32>
    %11 = tpu.matmul %6, %10, %cst_10 {dimension_numbers = #tpu.dot_dimension_numbers<[1], [0], [0], [1], [0, 0, 1, 1], [], []>} : vector<8x128xbf16>, vector<128x128xbf16>, vector<8x128xf32> -> vector<8x128xf32>
    %12 = arith.addf %9, %11 : vector<8x128xf32>
    %13 = arith.addf %7, %12 : vector<8x128xf32>
    %c0_11 = arith.constant 0 : index
    %c0_12 = arith.constant 0 : index
    %14 = vector.load %arg9[%c0_11, %c0_12] : memref<8x128xf32, #tpu.memory_space<vmem>>, vector<8x128xf32>
    tpu.vector_store %arg9[%c0_11, %c0_12], %13 {strides = array<i32>} : memref<8x128xf32, #tpu.memory_space<vmem>>, vector<8x128xf32>,
    %c0_i32_13 = arith.constant 0 : i32
    %15 = arith.cmpi eq, %arg2, %c0_i32_13 : i32
    %16 = arith.extui %15 : i1 to i32
    %c0_i32_14 = arith.constant 0 : i32
    %17 = arith.cmpi ne, %16, %c0_i32_14 : i32
    scf.if %17 {
      %c0_15 = arith.constant 0 : index
      %c0_16 = arith.constant 0 : index
      %18 = vector.load %arg9[%c0_15, %c0_16] : memref<8x128xf32, #tpu.memory_space<vmem>>, vector<8x128xf32>
      %c0_17 = arith.constant 0 : index
      %c0_18 = arith.constant 0 : index
      %19 = vector.load %arg7[%c0_17, %c0_18] : memref<1x128xf32, #tpu.memory_space<vmem>>, vector<1x128xf32>
      %20 = vector.broadcast %19 : vector<1x128xf32> to vector<8x128xf32>
      %21 = arith.addf %18, %20 : vector<8x128xf32>
      %c0_19 = arith.constant 0 : index
      %c0_20 = arith.constant 0 : index
      %22 = vector.load %arg8[%c0_19, %c0_20] : memref<8x128xf32, #tpu.memory_space<vmem>>, vector<8x128xf32>
      tpu.vector_store %arg8[%c0_19, %c0_20], %21 {strides = array<i32>} : memref<8x128xf32, #tpu.memory_space<vmem>>, vector<8x128xf32>,
    } else {
    }
    return
  }
  func.func @transform_0(%arg0: i32, %arg1: i32, %arg2: i32) -> (i32, i32) {
    %c0_i32 = arith.constant 0 : i32
    return %arg0, %arg2 : i32, i32
  }
  func.func @transform_1(%arg0: i32, %arg1: i32, %arg2: i32) -> (i32, i32) {
    %c0_i32 = arith.constant 0 : i32
    %c0_i32_0 = arith.constant 0 : i32
    return %c0_i32, %arg2 : i32, i32
  }
  func.func @transform_2(%arg0: i32, %arg1: i32, %arg2: i32) -> (i32, i32) {
    %c0_i32 = arith.constant 0 : i32
    return %arg2, %arg1 : i32, i32
  }
  func.func @transform_3(%arg0: i32, %arg1: i32, %arg2: i32) -> (i32, i32) {
    %c0_i32 = arith.constant 0 : i32
    return %arg2, %arg1 : i32, i32
  }
  func.func @transform_4(%arg0: i32, %arg1: i32, %arg2: i32) -> (i32, i32) {
    %c0_i32 = arith.constant 0 : i32
    %c0_i32_0 = arith.constant 0 : i32
    return %c0_i32, %arg1 : i32, i32
  }
  func.func @transform_5(%arg0: i32, %arg1: i32, %arg2: i32) -> (i32, i32) {
    %c0_i32 = arith.constant 0 : i32
    return %arg0, %arg1 : i32, i32
  }
}

</mosaic_0001>

<bundles_post_ra>
// kernel: tpu_custom_call.1
= control target key start
LH: loop header
LB: loop body
LE: loop exit
PB: predicated region body
PF: predicated region fallthrough
CT: control target
= control target key end

     0   :  { %10 = vsyncpa [#allocation4], 0  ;;  %s607_s0 = inlined_call_operand.hbm [shape: bf16[8,128], index: 0, kind: input, shape index: {}]   ;;  %s608_s1 = inlined_call_operand.vmem [shape: bf16[1,128], index: 1, kind: input, shape index: {}]   ;;  %s609_s2 = inlined_call_operand.hbm [shape: bf16[128,128], index: 2, kind: input, shape index: {}]   ;;  %s610_s3 = inlined_call_operand.hbm [shape: bf16[128,128], index: 3, kind: input, shape index: {}]   ;;  %s611_s4 = inlined_call_operand.vmem [shape: f32[1,128], index: 4, kind: input, shape index: {}]   ;;  %s612_s5 = inlined_call_operand.hbm [shape: f32[8,128], index: 5, kind: output, shape index: {}]  }
   0x1   :  { %11 = vsyncpa [#allocation7], 0 }
   0x2   :  { %12 = vsyncpa [#allocation5], 0  ;;  %s509_s18 = smov [#allocation6]   ;;  %s415_s22 = scalar_lea.hbm %s609_s2, 1024 }
   0x3   :  { %s30_s19 = sshll.u32 %s509_s18, 4  ;;  %p416_p0 = scmp.ne.s32.totalorder %s609_s2, %s415_s22  ;;  %s31_s19 = int_to_ptr.vmem [resolvable:$true] %s30_s19 }
   0x4   :  { %p419_p1 = scmp.lt.u32.totalorder %s415_s22, %s609_s2 }
   0x6   :  { %p421_p2 = pnand %p419_p1, %p416_p0 }
   0x8   :  { %424 = shalt.err (!%p421_p2)
}
   0x9   :  { %s425_s27 = scalar_lea.vmem %s31_s19, 1024  ;;  %p430_p4 = scmp.lt.s32.totalorder %s31_s19, %s31_s19 }
   0xa   :  { %p426_p3 = scmp.ne.s32.totalorder %s31_s19, %s425_s27  ;;  %p431_p5 = scmp.lt.s32.totalorder %s425_s27, %s425_s27 }
   0xc   :  { %p432_p6 = por %p431_p5, %p430_p4 }
   0xe   :  { %p433_p7 = pnand %p432_p6, %p426_p3 }
  0x10   :  { %436 = shalt.err (!%p433_p7)
}
  0x11   :  { %s510_s28 = smov 64   ;;  %s511_s29 = smov 4  }
  0x12   :  { %36 = dma.hbm_to_vmem [thread:$0]  %s609_s2, 1024, %s31_s19, [#allocation7], %s510_s28, %s510_s28, %s511_s29  }
  0x13   :  { %s512_s7 = smov [#allocation3]   ;;  %s513_s9 = smov [#allocation8]  }
  0x14   :  { %s19_s8 = sshll.u32 %s512_s7, 4  ;;  %s42_s10 = sshll.u32 %s513_s9, 4  ;;  %s20_s8 = int_to_ptr.vmem [resolvable:$true] %s19_s8  ;;  %s43_s10 = int_to_ptr.vmem [resolvable:$true] %s42_s10 }
  0x15   :  { %s437_s13 = scalar_lea.hbm %s607_s0, 64 }
  0x16   :  { %p438_p8 = scmp.ne.s32.totalorder %s607_s0, %s437_s13  ;;  %p441_p9 = scmp.lt.u32.totalorder %s437_s13, %s607_s0 }
  0x18   :  { %p443_p10 = pnand %p441_p9, %p438_p8 }
  0x1a   :  { %446 = shalt.err (!%p443_p10)
}
  0x1b   :  { %s447_s2 = scalar_lea.vmem %s20_s8, 64  ;;  %p452_p12 = scmp.lt.s32.totalorder %s20_s8, %s20_s8 }
  0x1c   :  { %p448_p11 = scmp.ne.s32.totalorder %s20_s8, %s447_s2  ;;  %p453_p13 = scmp.lt.s32.totalorder %s447_s2, %s447_s2 }
  0x1e   :  { %p454_p0 = por %p453_p13, %p452_p12 }
  0x20   :  { %p455_p1 = pnand %p454_p0, %p448_p11 }
  0x22   :  { %458 = shalt.err (!%p455_p1)
}
  0x23   :  { %22 = dma.hbm_to_vmem [thread:$0]  %s607_s0, 64, %s20_s8, [#allocation4]  }
  0x24   :  { %s459_s22 = scalar_lea.hbm %s610_s3, 1024 }
  0x25   :  { %p460_p2 = scmp.ne.s32.totalorder %s610_s3, %s459_s22  ;;  %p463_p3 = scmp.lt.u32.totalorder %s459_s22, %s610_s3 }
  0x27   :  { %p465_p4 = pnand %p463_p3, %p460_p2 }
  0x29   :  { %468 = shalt.err (!%p465_p4)
}
  0x2a   :  { %s469_s27 = scalar_lea.vmem %s43_s10, 1024  ;;  %p474_p6 = scmp.lt.s32.totalorder %s43_s10, %s43_s10 }
  0x2b   :  { %p470_p5 = scmp.ne.s32.totalorder %s43_s10, %s469_s27  ;;  %p475_p7 = scmp.lt.s32.totalorder %s469_s27, %s469_s27 }
  0x2d   :  { %p476_p8 = por %p475_p7, %p474_p6 }
  0x2f   :  { %p477_p9 = pnand %p476_p8, %p470_p5 }
  0x31   :  { %480 = shalt.err (!%p477_p9)
}
  0x32   :  { %48 = dma.hbm_to_vmem [thread:$0]  %s610_s3, 1024, %s43_s10, [#allocation7], %s510_s28, %s510_s28, %s511_s29  }
  0x33   :  { %503 = dma.done.wait [#allocation4], 64  }
  0x34   :  { %504 = vsyncadd [#allocation4], 4294967232 }
  0x35   :  { %505 = dma.done.wait [#allocation7], 2048  }
  0x36   :  { %506 = vsyncadd [#allocation7], 4294965248  ;;  %v514_v0 = vmov 0.0   ;;  %vm515_vm0 = vmmov 0   ;;  %v399_v1 = vld [vmem:[#allocation8] sm:$0xff]   ;;  %v401_v3 = vld [vmem:[#allocation8 + $0x8] sm:$0xff]   ;;  %v71_v9 = vlaneseq }
  0x37   :  { %351 = vmatprep.subr.bf16.mxu0 %v514_v0  ;;  %371 = vmatprep.subr.bf16.mxu1 %v514_v0  ;;  %v400_v2 = vld [vmem:[#allocation6] sm:$0xff]   ;;  %v402_v4 = vld [vmem:[#allocation6 + $0x8] sm:$0xff]   ;;  %v403_v5 = vld [vmem:[#allocation8 + $0x10] sm:$0xff]   ;;  %s516_s6 = smov [#allocation9]  }
  0x38   :  { %367 = vmatprep.mubr.msk.bf16.mxu0 %vm515_vm0, %v514_v0  ;;  %387 = vmatprep.mubr.msk.bf16.mxu1 %vm515_vm0, %v514_v0  ;;  %v404_v6 = vld [vmem:[#allocation6 + $0x10] sm:$0xff]   ;;  %v405_v7 = vld [vmem:[#allocation8 + $0x18] sm:$0xff]   ;;  %v407_v10 = vld [vmem:[#allocation8 + $0x20] sm:$0xff]   ;;  %v72_v12 = vshrl.u32 %v71_v9, 7  ;;  %s306_s7 = sshll.u32 %s516_s6, 4  ;;  %s307_s7 = int_to_ptr.vmem [resolvable:$true] %s306_s7 }
  0x39   :  { %352 = vmatpush3.bf16.msra.mxu0 %v399_v1  ;;  %372 = vmatpush3.bf16.msra.mxu1 %v400_v2  ;;  %v406_v8 = vld [vmem:[#allocation6 + $0x18] sm:$0xff]   ;;  %v408_v11 = vld [vmem:[#allocation6 + $0x20] sm:$0xff]   ;;  %v409_v13 = vld [vmem:[#allocation8 + $0x28] sm:$0xff]   ;;  %s481_s8 = scalar_lea.vmem %s307_s7, 128  ;;  %p486_p11 = scmp.lt.s32.totalorder %s307_s7, %s307_s7 }
  0x3a   :  { %353 = vmatprep.subr.bf16.mxu0 %v514_v0  ;;  %373 = vmatprep.subr.bf16.mxu1 %v514_v0  ;;  %v67_v14 = vld [vmem:[%s608_s1] sm:$0x1]  ;;  %v410_v15 = vld [vmem:[#allocation6 + $0x28] sm:$0xff]   ;;  %v73_v17 = vsub.s32 0, %v72_v12  ;;  %v411_v18 = vld [vmem:[#allocation8 + $0x30] sm:$0xff]   ;;  %p482_p10 = scmp.ne.s32.totalorder %s307_s7, %s481_s8  ;;  %p487_p12 = scmp.lt.s32.totalorder %s481_s8, %s481_s8 }
  0x3b   :  { %v69_v16 = vpack.i.b16 %v67_v14, %v67_v14  ;;  %v412_v19 = vld [vmem:[#allocation6 + $0x30] sm:$0xff]   ;;  %v413_v21 = vld [vmem:[#allocation8 + $0x38] sm:$0xff]  }
  0x3c   :  { %v66_v22 = vld [vmem:[#allocation3] sm:$0xf]  ;;  %p488_p13 = por %p487_p12, %p486_p11 }
  0x3d   :  { %354 = vmatpush3.bf16.msra.mxu0 %v401_v3  ;;  %374 = vmatpush3.bf16.msra.mxu1 %v402_v4  ;;  %v74_v20 = vrot.slane %v69_v16, %v73_v17  ;;  %v414_v23 = vld [vmem:[#allocation6 + $0x38] sm:$0xff]  }
  0x3e   :  { %355 = vmatprep.subr.bf16.mxu0 %v514_v0  ;;  %375 = vmatprep.subr.bf16.mxu1 %v514_v0  ;;  %v332_v27 = vld [vmem:[%s611_s4] ss:$0 sm:$0xff]  ;;  %p489_p0 = pnand %p488_p13, %p482_p10 }
  0x3f   :  { %v75_v24 = vmul.bf16 %v74_v20, %v66_v22 }
  0x41   :  { %356 = vmatpush3.bf16.msra.mxu0 %v403_v5  ;;  %376 = vmatpush3.bf16.msra.mxu1 %v404_v6 }
  0x42   :  { %357 = vmatprep.subr.bf16.mxu0 %v514_v0  ;;  %377 = vmatprep.subr.bf16.mxu1 %v514_v0 }
  0x45   :  { %358 = vmatpush3.bf16.msra.mxu0 %v405_v7  ;;  %378 = vmatpush3.bf16.msra.mxu1 %v406_v8 }
  0x46   :  { %359 = vmatprep.subr.bf16.mxu0 %v514_v0  ;;  %379 = vmatprep.subr.bf16.mxu1 %v514_v0 }
  0x49   :  { %360 = vmatpush3.bf16.msra.mxu0 %v407_v10  ;;  %380 = vmatpush3.bf16.msra.mxu1 %v408_v11 }
  0x4a   :  { %361 = vmatprep.subr.bf16.mxu0 %v514_v0  ;;  %381 = vmatprep.subr.bf16.mxu1 %v514_v0 }
  0x4d   :  { %362 = vmatpush3.bf16.msra.mxu0 %v409_v13  ;;  %382 = vmatpush3.bf16.msra.mxu1 %v410_v15 }
  0x4e   :  { %363 = vmatprep.subr.bf16.mxu0 %v514_v0  ;;  %383 = vmatprep.subr.bf16.mxu1 %v514_v0 }
  0x51   :  { %364 = vmatpush3.bf16.msra.mxu0 %v411_v18  ;;  %384 = vmatpush3.bf16.msra.mxu1 %v412_v19 }
  0x52   :  { %365 = vmatprep.subr.bf16.mxu0 %v514_v0  ;;  %385 = vmatprep.subr.bf16.mxu1 %v514_v0 }
  0x55   :  { %366 = vmatpush3.bf16.msra.mxu0 %v413_v21  ;;  %386 = vmatpush3.bf16.msra.mxu1 %v414_v23 }
  0x58   :  { %368 = vmatmul.mubr.bf16.vlgmr.msra.gmra.mrb[0].mxu0 %v75_v24  ;;  %388 = vmatmul.mubr.bf16.vlgmr.msra.gmra.mrb[0].mxu1 %v66_v22 }
 0x12b   :  { %v191_v25 = vpop.f32.mrb[0].mxu0  ;;  %v279_v26 = vpop.f32.mrb[0].mxu1 }
 0x12c   :  { %v369_v28 = vpop.f32.mrb[1].mxu0  ;;  %v280_v29 = vadd.f32 %v279_v26, %v191_v25  ;;  %v389_v30 = vpop.f32.mrb[1].mxu1 }
 0x12d   :  { %v194_v31 = vpop.f32.mrb[2].mxu0  ;;  %v282_v32 = vpop.f32.mrb[2].mxu1 }
 0x12e   :  { %v370_v33 = vpop.f32.mrb[3].mxu0  ;;  %v298_v34 = vadd.f32 %v332_v27, %v280_v29  ;;  %v390_v35 = vpop.f32.mrb[3].mxu1 }
 0x130   :  { %299 = vst [vmem:[#allocation9] sm:$0xff] %v298_v34 }
 0x131   :  { %492 = shalt.err (!%p489_p0)
}
 0x132   :  { %s493_s10 = scalar_lea.hbm %s612_s5, 128 }
 0x133   :  { %p494_p1 = scmp.ne.s32.totalorder %s612_s5, %s493_s10  ;;  %p497_p2 = scmp.lt.u32.totalorder %s493_s10, %s612_s5 }
 0x135   :  { %p499_p3 = pnand %p497_p2, %p494_p1 }
 0x137   :  { %502 = shalt.err (!%p499_p3)
}
 0x138   :  { %309 = dma.vmem_to_hbm [thread:$0]  %s307_s7, 128, %s612_s5, [#allocation5]  }
 0x139   :  { %507 = dma.done.wait [#allocation5], 128  }
 0x13a   :  { %508 = vsyncadd [#allocation5], 4294967168 }
 0x13b   :  { %313 = vsyncpa [#allocation4], 1 }
 0x13c   :  { %314 = vsyncpa [#allocation7], 1 }
 0x13d   :  { %315 = vsyncpa [#allocation5], 1 }

</bundles_post_ra>
